<compile_context>
chip_gen: v7x
topology: tpu7x:2x2x1
jax: 0.10.0
libtpu: 0.0.40
codegen_flags: <defaults>
</compile_context>

<pallas_src>
import functools

import jax
import jax.numpy as jnp
from jax import lax
from jax.experimental import pallas as pl
from jax.experimental.pallas import tpu as pltpu


def _cosine_loss_kernel(x_ref, y_ref, o_ref, *, eps, n_rows, tile_n, rows_sub,
                        use_mxu):
    """One grid step: partial sum of cosine similarities over one row tile.

    The tile is walked in `rows_sub`-row sub-chunks so the DMA block can be
    several MiB (amortizing per-step overhead) while the compute working set
    (products, row sums, masks) stays small in VMEM.
    """
    i = pl.program_id(0)
    d = x_ref.shape[1]
    n_sub = tile_n // rows_sub
    need_mask = (n_rows % tile_n) != 0          # static, trace-time check
    eps2 = jnp.float32(eps) * jnp.float32(eps)

    if use_mxu:
        # All-ones RHS: jnp.dot(p, ones) == per-row sum of p replicated across
        # all 128 output lanes.  This moves the 3 cross-lane feature reductions
        # off the XLU (the v6e/v7x bottleneck for small D) onto the idle MXU.
        ones = jnp.ones((d, 128), jnp.bfloat16)

        def _row_sum(p):                         # p: (rows_sub, d) float32
            # Split-accurate bf16 matmul: p == p_hi + p_lo to ~2^-18 relative;
            # both halves are exact MXU operands and accumulation is f32, so the
            # result matches an f32 jnp.sum reduction to ~1e-6 relative.
            p_hi = p.astype(jnp.bfloat16)
            p_lo = (p - p_hi.astype(jnp.float32)).astype(jnp.bfloat16)
            return (jnp.dot(p_hi, ones, preferred_element_type=jnp.float32)
                    + jnp.dot(p_lo, ones, preferred_element_type=jnp.float32))

    def _chunk_partial(c):
        r0 = c * rows_sub
        if not isinstance(r0, int):
            r0 = pl.multiple_of(r0, rows_sub)
        x = x_ref[pl.ds(r0, rows_sub), :]
        y = y_ref[pl.ds(r0, rows_sub), :]
        # Skip redundant casts in the f32 path (static, trace-time check).
        if x.dtype != jnp.float32:
            x = x.astype(jnp.float32)
        if y.dtype != jnp.float32:
            y = y.astype(jnp.float32)

        if use_mxu:
            dot = _row_sum(x * y)                # (rows_sub, 128), lanes equal
            sxx = _row_sum(x * x)
            syy = _row_sum(y * y)
        else:
            # Large / non-128-multiple D: VPU multiplies + XLU lane reductions
            # (already HBM-bound there; also the v5e-friendly path).
            dot = jnp.sum(x * y, axis=-1, keepdims=True)   # (rows_sub, 1)
            sxx = jnp.sum(x * x, axis=-1, keepdims=True)
            syy = jnp.sum(y * y, axis=-1, keepdims=True)

        # F.cosine_similarity: x.y / (max(||x||, eps) * max(||y||, eps)), fused
        # as 2 rsqrt + 2 mul (EUP slot); exact since
        # max(sqrt(s), eps) == sqrt(max(s, eps^2)).
        sim = (dot * lax.rsqrt(jnp.maximum(sxx, eps2))
                   * lax.rsqrt(jnp.maximum(syy, eps2)))

        if need_mask:
            # Rows past N in the (padded) last tile may hold Inf/NaN garbage; it
            # stays confined to those rows (elementwise ops + per-row reductions
            # only) and the select below drops it — select does not propagate
            # NaN from the unselected branch.
            row = (i * tile_n + r0
                   + lax.broadcasted_iota(jnp.int32, (rows_sub, 1), 0))
            sim = jnp.where(row < n_rows, sim, 0.0)

        return jnp.sum(sim, axis=0, keepdims=True)   # (1, 128) or (1, 1)

    if n_sub == 1:
        acc = _chunk_partial(0)
    else:
        width = 128 if use_mxu else 1
        acc = lax.fori_loop(0, n_sub,
                            lambda c, a: a + _chunk_partial(c),
                            jnp.zeros((1, width), jnp.float32))

    # Lane-dense (1, 8, 128) output block; the wrapper reads element [0, 0] of
    # every tile and finishes the mean.
    o_ref[...] = jnp.broadcast_to(acc.reshape(1, 1, -1), o_ref.shape)


def _vmem_capacity_bytes():
    try:
        return int(pltpu.get_tpu_info().vmem_capacity_bytes)
    except Exception:
        return 64 * 1024 * 1024          # assume the smaller (v7x-sized) VMEM


def _choose_rows_sub(n_rows, d, target_elems=64 * 1024, max_rows=512):
    """In-kernel sub-chunk height: keeps per-iteration intermediates ~<=1 MiB."""
    rows = max(8, min(max_rows, (target_elems // max(1, d)) // 8 * 8))
    n_pad8 = ((n_rows + 7) // 8) * 8
    return int(max(8, min(rows, n_pad8)))


def _choose_tile_n(n_rows, d, itemsize, rows_sub, target_block_bytes):
    """DMA row tile: ~target_block_bytes per input block, a multiple of rows_sub,
    clamped so the grid has >= 4 steps (keeps both v7x TensorCores busy)."""
    rows = (target_block_bytes // max(1, d * itemsize)) // rows_sub * rows_sub
    rows = max(rows_sub, rows)
    per_quarter = -(-n_rows // 4)                             # cdiv(N, 4)
    per_quarter = -(-per_quarter // rows_sub) * rows_sub      # round up
    rows = min(rows, max(rows_sub, per_quarter))
    n_pad = -(-n_rows // rows_sub) * rows_sub
    return int(max(rows_sub, min(rows, n_pad)))


def cosine_loss(x, y, *, eps=1e-8, tile_n=None, rows_sub=None,
                use_mxu_reduce=None):
    """Mean cosine similarity of x and y (shape (N, D)), cos-sim along dim=1."""
    assert x.shape == y.shape and x.ndim == 2, "expected matching (N, D) inputs"
    N, D = x.shape
    itemsize = jnp.dtype(x.dtype).itemsize

    if use_mxu_reduce is None:
        # MXU "ones-matmul" reduction pays off where the XLU would otherwise cap
        # the kernel (small D on v6e/v7x); for large D the lane reductions
        # amortize and the plain path is already HBM-bound.
        use_mxu_reduce = (D % 128 == 0) and (D <= 2048)

    if rows_sub is None:
        rows_sub = _choose_rows_sub(N, D)
    assert rows_sub % 8 == 0, "rows_sub must be a multiple of 8"

    # Generation-aware DMA block / VMEM budget (double-buffered: 2 inputs x 2
    # buffers x block):
    #   v5e/v6e (128 MiB physical VMEM): ~8 MiB blocks, 64 MiB scoped limit.
    #   v7x (64 MiB physical VMEM) or unknown: ~4 MiB blocks, 40 MiB limit.
    if _vmem_capacity_bytes() >= 100 * 1024 * 1024:
        target_block_bytes, vmem_limit = 8 << 20, 64 << 20
    else:
        target_block_bytes, vmem_limit = 4 << 20, 40 << 20

    if tile_n is None:
        tile_n = _choose_tile_n(N, D, itemsize, rows_sub, target_block_bytes)
    assert tile_n % rows_sub == 0, "tile_n must be a multiple of rows_sub"

    num_tiles = pl.cdiv(N, tile_n)
    kernel = functools.partial(_cosine_loss_kernel, eps=eps, n_rows=N,
                               tile_n=tile_n, rows_sub=rows_sub,
                               use_mxu=use_mxu_reduce)

    partials = pl.pallas_call(
        kernel,
        out_shape=jax.ShapeDtypeStruct((num_tiles, 8, 128), jnp.float32),
        grid_spec=pltpu.PrefetchScalarGridSpec(
            num_scalar_prefetch=0,
            grid=(num_tiles,),
            in_specs=[
                pl.BlockSpec((tile_n, D), lambda i: (i, 0)),
                pl.BlockSpec((tile_n, D), lambda i: (i, 0)),
            ],
            out_specs=pl.BlockSpec((1, 8, 128), lambda i: (i, 0, 0)),
        ),
        compiler_params=pltpu.CompilerParams(
            # Row tiles are independent -> parallel axis (megacore / both v7x TCs).
            dimension_semantics=("parallel",),
            vmem_limit_bytes=vmem_limit,
        ),
    )(x, y)

    # TODO(synk): for very large D (an 8-row block alone exceeding the VMEM
    # budget), add a second, last, "arbitrary" grid axis over the feature dim
    # carrying per-row (dot, sxx, syy) partials in VMEM scratch.
    return jnp.sum(partials[:, 0, 0]) / jnp.float32(N)


def _reference(x, y, eps=1e-8):
    """Pure-JAX reference matching torch.nn.functional.cosine_similarity + mean."""
    xf = x.astype(jnp.float32)
    yf = y.astype(jnp.float32)
    nx = jnp.maximum(jnp.linalg.norm(xf, axis=1), eps)
    ny = jnp.maximum(jnp.linalg.norm(yf, axis=1), eps)
    return jnp.mean(jnp.sum(xf * yf, axis=1) / (nx * ny))


if __name__ == "__main__":
    key = jax.random.PRNGKey(0)
    k1, k2 = jax.random.split(key)
    N, D = 100, 128  # scale of the module docstring example (100, 128)
    x = jax.random.normal(k1, (N, D), dtype=jnp.float32)
    y = jax.random.normal(k2, (N, D), dtype=jnp.float32)

    ref = _reference(x, y, eps=1e-8)

    # Auto-sized tiles (single partial tile): MXU reduction path + row mask.
    loss = jax.block_until_ready(cosine_loss(x, y, eps=1e-8))
    assert jnp.allclose(loss, ref, atol=1e-5, rtol=1e-5), (loss, ref)

    # Multi-tile + in-kernel sub-chunk loop (2 row tiles, 2 sub-chunks each,
    # last tile partially out of range).
    loss_mt = jax.block_until_ready(
        cosine_loss(x, y, eps=1e-8, tile_n=64, rows_sub=32))
    assert jnp.allclose(loss_mt, ref, atol=1e-5, rtol=1e-5), (loss_mt, ref)

    # Fallback (pure VPU/XLU) reduction path.
    loss_fb = jax.block_until_ready(
        cosine_loss(x, y, eps=1e-8, tile_n=64, rows_sub=32,
                    use_mxu_reduce=False))
    assert jnp.allclose(loss_fb, ref, atol=1e-5, rtol=1e-5), (loss_fb, ref)

    # bf16 inputs: byte-based tiling + in-kernel f32 upcast.
    xb = x.astype(jnp.bfloat16)
    yb = y.astype(jnp.bfloat16)
    ref_bf = _reference(xb, yb, eps=1e-8)
    loss_bf = jax.block_until_ready(cosine_loss(xb, yb, eps=1e-8))
    assert jnp.allclose(loss_bf, ref_bf, atol=1e-4, rtol=1e-4), (loss_bf, ref_bf)

    print("KERNEL_OK")
</pallas_src>

<mosaic_0001>
module attributes {stable_mosaic.version = 11 : i64} {
  func.func @_cosine_loss_kernel(%arg0: i32, %arg1: memref<104x128xf32, #tpu.memory_space<vmem>>, %arg2: memref<104x128xf32, #tpu.memory_space<vmem>>, %arg3: memref<1x8x128xf32, #tpu.memory_space<vmem>>) attributes {dimension_semantics = [#tpu.dimension_semantics<parallel>], iteration_bounds = array<i64: 1>, scalar_prefetch = 0 : i64, scratch_operands = 0 : i64, tpu.core_type = #tpu.core_type<tc>, window_params = [{transform_indices = @transform_0, window_bounds = array<i64: 104, 128>}, {transform_indices = @transform_1, window_bounds = array<i64: 104, 128>}, {transform_indices = @transform_2, window_bounds = array<i64: 1, 8, 128>}]} {
    %cst = arith.constant 9.99999993E-9 : f32
    %cst_0 = arith.constant 9.99999993E-9 : f32
    %0 = arith.mulf %cst, %cst_0 : f32
    %cst_1 = arith.constant 1.000000e+00 : bf16
    %1 = vector.broadcast %cst_1 : bf16 to vector<128x128xbf16>
    %c0 = arith.constant 0 : index
    %c0_2 = arith.constant 0 : index
    %2 = vector.load %arg1[%c0, %c0_2] : memref<104x128xf32, #tpu.memory_space<vmem>>, vector<104x128xf32>
    %c0_3 = arith.constant 0 : index
    %c0_4 = arith.constant 0 : index
    %3 = vector.load %arg2[%c0_3, %c0_4] : memref<104x128xf32, #tpu.memory_space<vmem>>, vector<104x128xf32>
    %4 = arith.mulf %2, %3 : vector<104x128xf32>
    %5 = arith.truncf %4 : vector<104x128xf32> to vector<104x128xbf16>
    %6 = arith.extf %5 : vector<104x128xbf16> to vector<104x128xf32>
    %7 = arith.subf %4, %6 : vector<104x128xf32>
    %8 = arith.truncf %7 : vector<104x128xf32> to vector<104x128xbf16>
    %cst_5 = arith.constant dense<0.000000e+00> : vector<104x128xf32>
    %9 = tpu.matmul %5, %1, %cst_5 {dimension_numbers = #tpu.dot_dimension_numbers<[1], [0], [0], [1], [0, 0, 1, 1], [], []>} : vector<104x128xbf16>, vector<128x128xbf16>, vector<104x128xf32> -> vector<104x128xf32>
    %cst_6 = arith.constant dense<0.000000e+00> : vector<104x128xf32>
    %10 = tpu.matmul %8, %1, %cst_6 {dimension_numbers = #tpu.dot_dimension_numbers<[1], [0], [0], [1], [0, 0, 1, 1], [], []>} : vector<104x128xbf16>, vector<128x128xbf16>, vector<104x128xf32> -> vector<104x128xf32>
    %11 = arith.addf %9, %10 : vector<104x128xf32>
    %12 = arith.mulf %2, %2 : vector<104x128xf32>
    %13 = arith.truncf %12 : vector<104x128xf32> to vector<104x128xbf16>
    %14 = arith.extf %13 : vector<104x128xbf16> to vector<104x128xf32>
    %15 = arith.subf %12, %14 : vector<104x128xf32>
    %16 = arith.truncf %15 : vector<104x128xf32> to vector<104x128xbf16>
    %cst_7 = arith.constant dense<0.000000e+00> : vector<104x128xf32>
    %17 = tpu.matmul %13, %1, %cst_7 {dimension_numbers = #tpu.dot_dimension_numbers<[1], [0], [0], [1], [0, 0, 1, 1], [], []>} : vector<104x128xbf16>, vector<128x128xbf16>, vector<104x128xf32> -> vector<104x128xf32>
    %cst_8 = arith.constant dense<0.000000e+00> : vector<104x128xf32>
    %18 = tpu.matmul %16, %1, %cst_8 {dimension_numbers = #tpu.dot_dimension_numbers<[1], [0], [0], [1], [0, 0, 1, 1], [], []>} : vector<104x128xbf16>, vector<128x128xbf16>, vector<104x128xf32> -> vector<104x128xf32>
    %19 = arith.addf %17, %18 : vector<104x128xf32>
    %20 = arith.mulf %3, %3 : vector<104x128xf32>
    %21 = arith.truncf %20 : vector<104x128xf32> to vector<104x128xbf16>
    %22 = arith.extf %21 : vector<104x128xbf16> to vector<104x128xf32>
    %23 = arith.subf %20, %22 : vector<104x128xf32>
    %24 = arith.truncf %23 : vector<104x128xf32> to vector<104x128xbf16>
    %cst_9 = arith.constant dense<0.000000e+00> : vector<104x128xf32>
    %25 = tpu.matmul %21, %1, %cst_9 {dimension_numbers = #tpu.dot_dimension_numbers<[1], [0], [0], [1], [0, 0, 1, 1], [], []>} : vector<104x128xbf16>, vector<128x128xbf16>, vector<104x128xf32> -> vector<104x128xf32>
    %cst_10 = arith.constant dense<0.000000e+00> : vector<104x128xf32>
    %26 = tpu.matmul %24, %1, %cst_10 {dimension_numbers = #tpu.dot_dimension_numbers<[1], [0], [0], [1], [0, 0, 1, 1], [], []>} : vector<104x128xbf16>, vector<128x128xbf16>, vector<104x128xf32> -> vector<104x128xf32>
    %27 = arith.addf %25, %26 : vector<104x128xf32>
    %28 = vector.broadcast %0 : f32 to vector<104x128xf32>
    %29 = arith.maximumf %19, %28 : vector<104x128xf32>
    %30 = math.rsqrt %29 : vector<104x128xf32>
    %31 = arith.mulf %11, %30 : vector<104x128xf32>
    %32 = vector.broadcast %0 : f32 to vector<104x128xf32>
    %33 = arith.maximumf %27, %32 : vector<104x128xf32>
    %34 = math.rsqrt %33 : vector<104x128xf32>
    %35 = arith.mulf %31, %34 : vector<104x128xf32>
    %c104_i32 = arith.constant 104 : i32
    %36 = arith.muli %arg0, %c104_i32 : i32
    %c0_i32 = arith.constant 0 : i32
    %37 = arith.addi %36, %c0_i32 : i32
    %38 = tpu.iota {dimensions = array<i32: 0>} : vector<104x1xi32>
    %39 = vector.broadcast %37 : i32 to vector<104x1xi32>
    %40 = arith.addi %39, %38 : vector<104x1xi32>
    %c100_i32 = arith.constant 100 : i32
    %41 = vector.broadcast %c100_i32 : i32 to vector<104x1xi32>
    %42 = arith.cmpi slt, %40, %41 : vector<104x1xi32>
    %cst_11 = arith.constant 0.000000e+00 : f32
    %43 = vector.shape_cast %42 : vector<104x1xi1> to vector<104x1xi1>
    %44 = vector.broadcast %43 : vector<104x1xi1> to vector<104x128xi1>
    %45 = vector.broadcast %cst_11 : f32 to vector<104x128xf32>
    %46 = arith.select %44, %35, %45 : vector<104x128xi1>, vector<104x128xf32>
    %cst_12 = arith.constant dense<0.000000e+00> : vector<128xf32>
    %47 = vector.multi_reduction <add>, %46, %cst_12 [0] : vector<104x128xf32> to vector<128xf32>
    %48 = vector.shape_cast %47 : vector<128xf32> to vector<1x128xf32>
    %49 = vector.shape_cast %48 : vector<1x128xf32> to vector<1x1x128xf32>
    %50 = vector.shape_cast %49 : vector<1x1x128xf32> to vector<1x1x128xf32>
    %51 = vector.broadcast %50 : vector<1x1x128xf32> to vector<1x8x128xf32>
    %c0_13 = arith.constant 0 : index
    %c0_14 = arith.constant 0 : index
    %c0_15 = arith.constant 0 : index
    %52 = vector.load %arg3[%c0_13, %c0_14, %c0_15] : memref<1x8x128xf32, #tpu.memory_space<vmem>>, vector<1x8x128xf32>
    tpu.vector_store %arg3[%c0_13, %c0_14, %c0_15], %51 {strides = array<i32>} : memref<1x8x128xf32, #tpu.memory_space<vmem>>, vector<1x8x128xf32>,
    return
  }
  func.func @transform_0(%arg0: i32) -> (i32, i32) {
    %c0_i32 = arith.constant 0 : i32
    %c0_i32_0 = arith.constant 0 : i32
    return %arg0, %c0_i32 : i32, i32
  }
  func.func @transform_1(%arg0: i32) -> (i32, i32) {
    %c0_i32 = arith.constant 0 : i32
    %c0_i32_0 = arith.constant 0 : i32
    return %arg0, %c0_i32 : i32, i32
  }
  func.func @transform_2(%arg0: i32) -> (i32, i32, i32) {
    %c0_i32 = arith.constant 0 : i32
    %c0_i32_0 = arith.constant 0 : i32
    %c0_i32_1 = arith.constant 0 : i32
    return %arg0, %c0_i32, %c0_i32_0 : i32, i32, i32
  }
}

</mosaic_0001>

<bundles_post_ra>
// kernel: tpu_custom_call.1
= control target key start
LH: loop header
LB: loop body
LE: loop exit
PB: predicated region body
PF: predicated region fallthrough
CT: control target
= control target key end

     0   :  { %7 = vsyncpa [#allocation3], 0  ;;  %s1972_s0 = inlined_call_operand.hbm [shape: f32[100,128], index: 0, kind: input, shape index: {}]   ;;  %s1973_s1 = inlined_call_operand.hbm [shape: f32[100,128], index: 1, kind: input, shape index: {}]   ;;  %s1974_s2 = inlined_call_operand.hbm [shape: f32[1,8,128], index: 2, kind: output, shape index: {}]  }
   0x1   :  { %8 = vsyncpa [#allocation6], 0 }
   0x2   :  { %9 = vsyncpa [#allocation4], 0  ;;  %s1504_s9 = smov [#allocation2]   ;;  %s1432_s13 = scalar_lea.hbm %s1972_s0, 1664 }
   0x3   :  { %s15_s10 = sshll.u32 %s1504_s9, 4  ;;  %p1433_p0 = scmp.ne.s32.totalorder %s1972_s0, %s1432_s13  ;;  %s16_s10 = int_to_ptr.vmem [resolvable:$true] %s15_s10 }
   0x4   :  { %p1436_p1 = scmp.lt.u32.totalorder %s1432_s13, %s1972_s0 }
   0x6   :  { %p1438_p2 = pnand %p1436_p1, %p1433_p0 }
   0x8   :  { %1441 = shalt.err (!%p1438_p2)
}
   0x9   :  { %s1442_s18 = scalar_lea.vmem %s16_s10, 1664  ;;  %p1447_p4 = scmp.lt.s32.totalorder %s16_s10, %s16_s10 }
   0xa   :  { %p1443_p3 = scmp.ne.s32.totalorder %s16_s10, %s1442_s18  ;;  %p1448_p5 = scmp.lt.s32.totalorder %s1442_s18, %s1442_s18 }
   0xc   :  { %p1449_p6 = por %p1448_p5, %p1447_p4 }
   0xe   :  { %p1450_p7 = pnand %p1449_p6, %p1443_p3 }
  0x10   :  { %1453 = shalt.err (!%p1450_p7)
}
  0x11   :  { %s1505_s19 = smov 128   ;;  %s1506_s20 = smov 8  }
  0x12   :  { %21 = dma.hbm_to_vmem [thread:$0]  %s1972_s0, 1664, %s16_s10, [#allocation3], %s1505_s19, %s1505_s19, %s1506_s20  }
  0x13   :  { %s1507_s23 = smov [#allocation5]   ;;  %s1454_s27 = scalar_lea.hbm %s1973_s1, 1664 }
  0x14   :  { %s27_s24 = sshll.u32 %s1507_s23, 4  ;;  %p1455_p8 = scmp.ne.s32.totalorder %s1973_s1, %s1454_s27  ;;  %s28_s24 = int_to_ptr.vmem [resolvable:$true] %s27_s24 }
  0x15   :  { %p1458_p9 = scmp.lt.u32.totalorder %s1454_s27, %s1973_s1 }
  0x17   :  { %p1460_p10 = pnand %p1458_p9, %p1455_p8 }
  0x19   :  { %1463 = shalt.err (!%p1460_p10)
}
  0x1a   :  { %s1464_s4 = scalar_lea.vmem %s28_s24, 1664  ;;  %p1469_p12 = scmp.lt.s32.totalorder %s28_s24, %s28_s24 }
  0x1b   :  { %p1465_p11 = scmp.ne.s32.totalorder %s28_s24, %s1464_s4  ;;  %p1470_p13 = scmp.lt.s32.totalorder %s1464_s4, %s1464_s4 }
  0x1d   :  { %p1471_p0 = por %p1470_p13, %p1469_p12 }
  0x1f   :  { %p1472_p1 = pnand %p1471_p0, %p1465_p11 }
  0x21   :  { %1475 = shalt.err (!%p1472_p1)
}
  0x22   :  { %33 = dma.hbm_to_vmem [thread:$0]  %s1973_s1, 1664, %s28_s24, [#allocation6], %s1505_s19, %s1505_s19, %s1506_s20  }
  0x23   :  { %1498 = dma.done.wait [#allocation3], 1664  }
  0x24   :  { %1499 = vsyncadd [#allocation3], 4294965632 }
  0x25   :  { %1500 = dma.done.wait [#allocation6], 1664  }
  0x26   :  { %1501 = vsyncadd [#allocation6], 4294965632  ;;  %v1508_v0 = vmov 0.0   ;;  %v1509_v1 = vmov 1065369472   ;;  %vm1510_vm0 = vmmov 0  }
  0x27   :  { %1039 = vmatprep.subr.bf16.mxu1 %v1508_v0  ;;  %1083 = vmatprep.subr.bf16.mxu0 %v1508_v0  ;;  %v1565_v2 = vld [vmem:[#allocation2] sm:$0xff]  ;;  %v1569_v3 = vld [vmem:[#allocation2 + $0x8] sm:$0xff]  ;;  %v1573_v5 = vld [vmem:[#allocation5 + $0x8] sm:$0xff]  ;;  %s1511_s1 = smov [#allocation7]  }
  0x28   :  { %1040 = vmatpush3.bf16.msra.mxu1 %v1509_v1  ;;  %1084 = vmatpush3.bf16.msra.mxu0 %v1509_v1  ;;  %v1571_v4 = vld [vmem:[#allocation5] sm:$0xff]  ;;  %v69_v7 = vmul.f32 %v1573_v5, %v1569_v3  ;;  %v1585_v9 = vld [vmem:[#allocation2 + $0x10] sm:$0xff]  ;;  %v1589_v10 = vld [vmem:[#allocation2 + $0x18] sm:$0xff]  ;;  %s939_s6 = sshll.u32 %s1511_s1, 4  ;;  %s940_s6 = int_to_ptr.vmem [resolvable:$true] %s939_s6 }
  0x29   :  { %1041 = vmatprep.subr.bf16.mxu1 %v1508_v0  ;;  %1085 = vmatprep.subr.bf16.mxu0 %v1508_v0  ;;  %v68_v6 = vmul.f32 %v1571_v4, %v1565_v2  ;;  %v1591_v11 = vld [vmem:[#allocation5 + $0x10] sm:$0xff]  ;;  %v1593_v12 = vld [vmem:[#allocation5 + $0x18] sm:$0xff]  ;;  %v1607_v21 = vld [vmem:[#allocation5 + $0x20] sm:$0xff]  ;;  %s1476_s7 = scalar_lea.vmem %s940_s6, 128  ;;  %p1481_p3 = scmp.lt.s32.totalorder %s940_s6, %s940_s6 }
  0x2a   :  { %1055 = vmatprep.mubr.msk.bf16.mxu1 %vm1510_vm0, %v1508_v0  ;;  %1099 = vmatprep.mubr.msk.bf16.mxu0 %vm1510_vm0, %v1508_v0  ;;  %v70_v15 = vmul.f32 %v1591_v11, %v1585_v9  ;;  %v71_v16 = vmul.f32 %v1593_v12, %v1589_v10  ;;  %v1605_v20 = vld [vmem:[#allocation2 + $0x20] sm:$0xff]  ;;  %v1611_v22 = vld [vmem:[#allocation2 + $0x28] sm:$0xff]  ;;  %v1613_v23 = vld [vmem:[#allocation5 + $0x28] sm:$0xff]  ;;  %p1477_p2 = scmp.ne.s32.totalorder %s940_s6, %s1476_s7  ;;  %p1482_p4 = scmp.lt.s32.totalorder %s1476_s7, %s1476_s7 }
  0x2b   :  { %v81_v8 = vpack.c.bf16 %v69_v7, %v68_v6  ;;  %v72_v24 = vmul.f32 %v1607_v21, %v1605_v20  ;;  %v73_v28 = vmul.f32 %v1613_v23, %v1611_v22  ;;  %v1625_v32 = vld [vmem:[#allocation2 + $0x30] sm:$0xff]  ;;  %v1627_v33 = vld [vmem:[#allocation5 + $0x30] sm:$0xff]  ;;  %v1633_v35 = vld [vmem:[#allocation5 + $0x38] sm:$0xff] }
  0x2c   :  { %1042 = vmatpush3.bf16.msra.mxu1 %v1509_v1  ;;  %1086 = vmatpush3.bf16.msra.mxu0 %v1509_v1  ;;  %v82_v19 = vpack.c.bf16 %v71_v16, %v70_v15  ;;  %v1631_v34 = vld [vmem:[#allocation2 + $0x38] sm:$0xff]  ;;  %v74_v36 = vmul.f32 %v1627_v33, %v1625_v32  ;;  %v1649_v44 = vld [vmem:[#allocation2 + $0x40] sm:$0xff]  ;;  %v1651_v45 = vld [vmem:[#allocation5 + $0x40] sm:$0xff]  ;;  %p1483_p5 = por %p1482_p4, %p1481_p3 }
  0x2d   :  { %1043 = vmatprep.subr.bf16.mxu1 %v1508_v0  ;;  %1087 = vmatprep.subr.bf16.mxu0 %v1508_v0  ;;  %v88_v13 = vunpack.c.l.bf16 %v81_v8  ;;  %v89_v14 = vunpack.c.h.bf16 %v81_v8  ;;  %v83_v31 = vpack.c.bf16 %v73_v28, %v72_v24  ;;  %v75_v40 = vmul.f32 %v1633_v35, %v1631_v34  ;;  %v1657_v46 = vld [vmem:[#allocation2 + $0x48] sm:$0xff]  ;;  %v1659_v47 = vld [vmem:[#allocation5 + $0x48] sm:$0xff]  ;;  %v1675_v57 = vld [vmem:[#allocation5 + $0x50] sm:$0xff] }
  0x2e   :  { %v90_v26 = vunpack.c.l.bf16 %v82_v19  ;;  %v91_v27 = vunpack.c.h.bf16 %v82_v19  ;;  %v76_v48 = vmul.f32 %v1651_v45, %v1649_v44  ;;  %v77_v52 = vmul.f32 %v1659_v47, %v1657_v46  ;;  %v1673_v56 = vld [vmem:[#allocation2 + $0x50] sm:$0xff]  ;;  %v1681_v58 = vld [vmem:[#allocation2 + $0x58] sm:$0xff]  ;;  %v1683_v59 = vld [vmem:[#allocation5 + $0x58] sm:$0xff]  ;;  %p1484_p6 = pnand %p1483_p5, %p1477_p2 }
  0x2f   :  { %v101_v17 = vsub.f32 %v68_v6, %v88_v13  ;;  %v102_v18 = vsub.f32 %v69_v7, %v89_v14  ;;  %v92_v38 = vunpack.c.l.bf16 %v83_v31  ;;  %v93_v39 = vunpack.c.h.bf16 %v83_v31  ;;  %v1701_v14 = vld [vmem:[#allocation2 + $0x60] sm:$0xff] }
  0x30   :  { %1044 = vmatpush3.bf16.msra.mxu1 %v1509_v1  ;;  %1088 = vmatpush3.bf16.msra.mxu0 %v1509_v1  ;;  %v103_v29 = vsub.f32 %v70_v15, %v90_v26  ;;  %v104_v30 = vsub.f32 %v71_v16, %v91_v27  ;;  %v84_v43 = vpack.c.bf16 %v75_v40, %v74_v36  ;;  %v1703_v15 = vld [vmem:[#allocation5 + $0x60] sm:$0xff] }
  0x31   :  { %1045 = vmatprep.subr.bf16.mxu1 %v1508_v0  ;;  %1089 = vmatprep.subr.bf16.mxu0 %v1508_v0  ;;  %v114_v25 = vpack.c.bf16 %v102_v18, %v101_v17  ;;  %v105_v41 = vsub.f32 %v72_v24, %v92_v38  ;;  %v106_v42 = vsub.f32 %v73_v28, %v93_v39 }
  0x32   :  { %v115_v37 = vpack.c.bf16 %v104_v30, %v103_v29  ;;  %v94_v50 = vunpack.c.l.bf16 %v84_v43  ;;  %v95_v51 = vunpack.c.h.bf16 %v84_v43  ;;  %v85_v55 = vpack.c.bf16 %v77_v52, %v76_v48 }
  0x33   :  { %v116_v49 = vpack.c.bf16 %v106_v42, %v105_v41  ;;  %v78_v60 = vmul.f32 %v1675_v57, %v1673_v56  ;;  %v79_v6 = vmul.f32 %v1683_v59, %v1681_v58  ;;  %v297_v27 = vmul.f32 %v1565_v2, %v1565_v2 }
  0x34   :  { %1046 = vmatpush3.bf16.msra.mxu1 %v1509_v1  ;;  %1090 = vmatpush3.bf16.msra.mxu0 %v1509_v1  ;;  %v107_v53 = vsub.f32 %v74_v36, %v94_v50  ;;  %v108_v54 = vsub.f32 %v75_v40, %v95_v51  ;;  %v96_v62 = vunpack.c.l.bf16 %v85_v55  ;;  %v97_v63 = vunpack.c.h.bf16 %v85_v55 }
  0x35   :  { %1047 = vmatprep.subr.bf16.mxu1 %v1508_v0  ;;  %1091 = vmatprep.subr.bf16.mxu0 %v1508_v0  ;;  %v86_v13 = vpack.c.bf16 %v79_v6, %v78_v60  ;;  %v298_v28 = vmul.f32 %v1569_v3, %v1569_v3  ;;  %v526_v29 = vmul.f32 %v1571_v4, %v1571_v4 }
  0x36   :  { %v117_v61 = vpack.c.bf16 %v108_v54, %v107_v53  ;;  %v109_v7 = vsub.f32 %v76_v48, %v96_v62  ;;  %v527_v30 = vmul.f32 %v1573_v5, %v1573_v5  ;;  %v299_v2 = vmul.f32 %v1585_v9, %v1585_v9 }
  0x37   :  { %v98_v17 = vunpack.c.l.bf16 %v86_v13  ;;  %v99_v18 = vunpack.c.h.bf16 %v86_v13  ;;  %v300_v40 = vmul.f32 %v1589_v10, %v1589_v10  ;;  %v529_v48 = vmul.f32 %v1593_v12, %v1593_v12 }
  0x38   :  { %1048 = vmatpush3.bf16.msra.mxu1 %v1509_v1  ;;  %1092 = vmatpush3.bf16.msra.mxu0 %v1509_v1  ;;  %v1729_v38 = vpack.c.bf16 %v527_v30, %v526_v29  ;;  %v301_v10 = vmul.f32 %v1605_v20, %v1605_v20 }
  0x39   :  { %1049 = vmatprep.subr.bf16.mxu1 %v1508_v0  ;;  %1093 = vmatprep.subr.bf16.mxu0 %v1508_v0  ;;  %v111_v24 = vsub.f32 %v78_v60, %v98_v17  ;;  %v1747_v50 = vpack.c.bf16 %v300_v40, %v299_v2  ;;  %v531_v60 = vmul.f32 %v1613_v23, %v1613_v23 }
  0x3a   :  { %v546_v5 = vunpack.c.l.bf16 %v1729_v38  ;;  %v547_v41 = vunpack.c.h.bf16 %v1729_v38  ;;  %v303_v17 = vmul.f32 %v1625_v32, %v1625_v32  ;;  %v533_v32 = vmul.f32 %v1633_v35, %v1633_v35 }
  0x3b   :  { %v319_v54 = vunpack.c.l.bf16 %v1747_v50  ;;  %v320_v62 = vunpack.c.h.bf16 %v1747_v50 }
  0x3c   :  { %1050 = vmatpush3.bf16.msra.mxu1 %v1509_v1  ;;  %1094 = vmatpush3.bf16.msra.mxu0 %v1509_v1  ;;  %v559_v51 = vsub.f32 %v526_v29, %v546_v5 }
  0x3d   :  { %1051 = vmatprep.subr.bf16.mxu1 %v1508_v0  ;;  %1095 = vmatprep.subr.bf16.mxu0 %v1508_v0 }
  0x40   :  { %1052 = vmatpush3.bf16.msra.mxu1 %v1509_v1  ;;  %1096 = vmatpush3.bf16.msra.mxu0 %v1509_v1 }
  0x41   :  { %1053 = vmatprep.subr.bf16.mxu1 %v1508_v0  ;;  %1097 = vmatprep.subr.bf16.mxu0 %v1508_v0 }
  0x44   :  { %1054 = vmatpush3.bf16.msra.mxu1 %v1509_v1  ;;  %1098 = vmatpush3.bf16.msra.mxu0 %v1509_v1 }
  0x45   :  { %1127 = vmatprep.subr.bf16.mxu1 %v1508_v0  ;;  %1215 = vmatprep.subr.bf16.mxu0 %v1508_v0 }
  0x47   :  { %1056 = vmatmul.mubr.bf16.vlgmr.msra.gmra.mrb[0].mxu1 %v114_v25  ;;  %1100 = vmatmul.mubr.bf16.vlgmr.msra.gmra.mrb[0].mxu0 %v81_v8  ;;  %v110_v8 = vsub.f32 %v77_v52, %v97_v63  ;;  %v112_v25 = vsub.f32 %v79_v6, %v99_v18  ;;  %v560_v52 = vsub.f32 %v527_v30, %v547_v41 }
  0x48   :  { %1128 = vmatpush3.bf16.msra.mxu1 %v1509_v1  ;;  %1216 = vmatpush3.bf16.msra.mxu0 %v1509_v1  ;;  %v304_v18 = vmul.f32 %v1631_v34, %v1631_v34  ;;  %v534_v41 = vmul.f32 %v1651_v45, %v1651_v45 }
  0x49   :  { %1059 = vmatprep.mubr.msk.bf16.mxu1 %vm1510_vm0, %v1508_v0  ;;  %1103 = vmatprep.mubr.msk.bf16.mxu0 %vm1510_vm0, %v1508_v0  ;;  %v118_v16 = vpack.c.bf16 %v110_v8, %v109_v7  ;;  %v332_v7 = vsub.f32 %v299_v2, %v319_v54  ;;  %v333_v8 = vsub.f32 %v300_v40, %v320_v62 }
  0x4a   :  { %1129 = vmatprep.subr.bf16.mxu1 %v1508_v0  ;;  %1217 = vmatprep.subr.bf16.mxu0 %v1508_v0  ;;  %v1795_v29 = vpack.c.bf16 %v304_v18, %v303_v17 }
  0x4c   :  { %1130 = vmatpush3.bf16.msra.mxu1 %v1509_v1  ;;  %1218 = vmatpush3.bf16.msra.mxu0 %v1509_v1 }
  0x4d   :  { %1131 = vmatprep.subr.bf16.mxu1 %v1508_v0  ;;  %1219 = vmatprep.subr.bf16.mxu0 %v1508_v0 }
  0x4f   :  { %1060 = vmatmul.mubr.bf16.gmra.mrb[4].mxu1 %v115_v37  ;;  %1104 = vmatmul.mubr.bf16.gmra.mrb[4].mxu0 %v82_v19  ;;  %v80_v19 = vmul.f32 %v1703_v15, %v1701_v14  ;;  %v1727_v37 = vpack.c.bf16 %v298_v28, %v297_v27 }
  0x50   :  { %1063 = vmatprep.mubr.msk.bf16.mxu1 %vm1510_vm0, %v1508_v0  ;;  %1107 = vmatprep.mubr.msk.bf16.mxu0 %vm1510_vm0, %v1508_v0 }
  0x51   :  { %1132 = vmatpush3.bf16.msra.mxu1 %v1509_v1  ;;  %1220 = vmatpush3.bf16.msra.mxu0 %v1509_v1  ;;  %v87_v26 = vpack.c.bf16 %v80_v19, %v80_v19  ;;  %v317_v3 = vunpack.c.l.bf16 %v1727_v37  ;;  %v318_v4 = vunpack.c.h.bf16 %v1727_v37 }
  0x52   :  { %1133 = vmatprep.subr.bf16.mxu1 %v1508_v0  ;;  %1221 = vmatprep.subr.bf16.mxu0 %v1508_v0 }
  0x53   :  { %v100_v36 = vunpack.c.l.bf16 %v87_v26  ;;  %v331_v9 = vsub.f32 %v298_v28, %v318_v4  ;;  %v306_v4 = vmul.f32 %v1657_v46, %v1657_v46 }
  0x55   :  { %1134 = vmatpush3.bf16.msra.mxu1 %v1509_v1  ;;  %1222 = vmatpush3.bf16.msra.mxu0 %v1509_v1  ;;  %v113_v39 = vsub.f32 %v80_v19, %v100_v36  ;;  %v323_v36 = vunpack.c.l.bf16 %v1795_v29 }
  0x56   :  { %1135 = vmatprep.subr.bf16.mxu1 %v1508_v0  ;;  %1223 = vmatprep.subr.bf16.mxu0 %v1508_v0 }
  0x57   :  { %1064 = vmatmul.mubr.bf16.gmra.mrb[8].mxu1 %v116_v49  ;;  %1108 = vmatmul.mubr.bf16.gmra.mrb[8].mxu0 %v83_v31  ;;  %v119_v31 = vpack.c.bf16 %v112_v25, %v111_v24  ;;  %v120_v42 = vpack.c.bf16 %v113_v39, %v113_v39  ;;  %v330_v49 = vsub.f32 %v297_v27, %v317_v3  ;;  %v324_v39 = vunpack.c.h.bf16 %v1795_v29 }
  0x58   :  { %1067 = vmatprep.mubr.msk.bf16.mxu1 %vm1510_vm0, %v1508_v0  ;;  %1111 = vmatprep.mubr.msk.bf16.mxu0 %vm1510_vm0, %v1508_v0  ;;  %v344_v25 = vpack.c.bf16 %v333_v8, %v332_v7  ;;  %v532_v27 = vmul.f32 %v1627_v33, %v1627_v33  ;;  %v305_v3 = vmul.f32 %v1649_v44, %v1649_v44 }
  0x59   :  { %1136 = vmatpush3.bf16.msra.mxu1 %v1509_v1  ;;  %1224 = vmatpush3.bf16.msra.mxu0 %v1509_v1  ;;  %v343_v12 = vpack.c.bf16 %v331_v9, %v330_v49  ;;  %v307_v9 = vmul.f32 %v1673_v56, %v1673_v56 }
  0x5a   :  { %1137 = vmatprep.subr.bf16.mxu1 %v1508_v0  ;;  %1225 = vmatprep.subr.bf16.mxu0 %v1508_v0  ;;  %v1797_v33 = vpack.c.bf16 %v533_v32, %v532_v27  ;;  %v1823_v44 = vpack.c.bf16 %v306_v4, %v305_v3 }
  0x5c   :  { %v552_v5 = vunpack.c.l.bf16 %v1797_v33  ;;  %v553_v40 = vunpack.c.h.bf16 %v1797_v33  ;;  %v326_v54 = vunpack.c.h.bf16 %v1823_v44 }
  0x5d   :  { %1138 = vmatpush3.bf16.msra.mxu1 %v1509_v1  ;;  %1226 = vmatpush3.bf16.msra.mxu0 %v1509_v1 }
  0x5e   :  { %1139 = vmatprep.subr.bf16.mxu1 %v1508_v0  ;;  %1227 = vmatprep.subr.bf16.mxu0 %v1508_v0  ;;  %v565_v46 = vsub.f32 %v532_v27, %v552_v5  ;;  %v566_v49 = vsub.f32 %v533_v32, %v553_v40 }
  0x5f   :  { %1068 = vmatmul.mubr.bf16.gmra.mrb[12].mxu1 %v117_v61  ;;  %1112 = vmatmul.mubr.bf16.gmra.mrb[12].mxu0 %v84_v43  ;;  %v528_v43 = vmul.f32 %v1591_v11, %v1591_v11  ;;  %v302_v11 = vmul.f32 %v1611_v22, %v1611_v22  ;;  %v572_v61 = vpack.c.bf16 %v560_v52, %v559_v51  ;;  %v325_v51 = vunpack.c.l.bf16 %v1823_v44 }
  0x60   :  { %1071 = vmatprep.mubr.msk.bf16.mxu1 %vm1510_vm0, %v1508_v0  ;;  %1115 = vmatprep.mubr.msk.bf16.mxu0 %vm1510_vm0, %v1508_v0  ;;  %v308_v52 = vmul.f32 %v1681_v58, %v1681_v58 }
  0x61   :  { %1140 = vmatpush3.bf16.msra.mxu1 %v1509_v1  ;;  %1228 = vmatpush3.bf16.msra.mxu0 %v1509_v1  ;;  %v1749_v53 = vpack.c.bf16 %v529_v48, %v528_v43  ;;  %v1767_v20 = vpack.c.bf16 %v302_v11, %v301_v10 }
  0x62   :  { %1141 = vmatprep.subr.bf16.mxu1 %v1508_v0  ;;  %1229 = vmatprep.subr.bf16.mxu0 %v1508_v0 }
  0x63   :  { %v548_v63 = vunpack.c.l.bf16 %v1749_v53  ;;  %v549_v6 = vunpack.c.h.bf16 %v1749_v53  ;;  %v321_v23 = vunpack.c.l.bf16 %v1767_v20 }
  0x65   :  { %1142 = vmatpush3.bf16.msra.mxu1 %v1509_v1  ;;  %1230 = vmatpush3.bf16.msra.mxu0 %v1509_v1  ;;  %v334_v34 = vsub.f32 %v301_v10, %v321_v23  ;;  %v536_v10 = vmul.f32 %v1675_v57, %v1675_v57  ;;  %v339_v57 = vsub.f32 %v306_v4, %v326_v54 }
  0x66   :  { %1171 = vmatprep.subr.bf16.mxu1 %v1508_v0  ;;  %1259 = vmatprep.subr.bf16.mxu0 %v1508_v0  ;;  %v309_v23 = vmul.f32 %v1701_v14, %v1701_v14 }
  0x67   :  { %1072 = vmatmul.mubr.bf16.gmra.mrb[16].mxu1 %v118_v16  ;;  %1116 = vmatmul.mubr.bf16.gmra.mrb[16].mxu0 %v85_v55  ;;  %v530_v55 = vmul.f32 %v1607_v21, %v1607_v21  ;;  %v562_v21 = vsub.f32 %v529_v48, %v549_v6  ;;  %v322_v16 = vunpack.c.h.bf16 %v1767_v20  ;;  %v337_v48 = vsub.f32 %v304_v18, %v324_v39 }
  0x68   :  { %1075 = vmatprep.mubr.msk.bf16.mxu1 %vm1510_vm0, %v1508_v0  ;;  %1119 = vmatprep.mubr.msk.bf16.mxu0 %vm1510_vm0, %v1508_v0 }
  0x69   :  { %v1769_v22 = vpack.c.bf16 %v531_v60, %v530_v55  ;;  %v335_v28 = vsub.f32 %v302_v11, %v322_v16  ;;  %v537_v11 = vmul.f32 %v1683_v59, %v1683_v59  ;;  %v538_v16 = vmul.f32 %v1703_v15, %v1703_v15 }
  0x6b   :  { %v550_v19 = vunpack.c.l.bf16 %v1769_v22  ;;  %v551_v24 = vunpack.c.h.bf16 %v1769_v22  ;;  %v345_v35 = vpack.c.bf16 %v335_v28, %v334_v34  ;;  %v1851_v58 = vpack.c.bf16 %v537_v11, %v536_v10 }
  0x6d   :  { %v563_v30 = vsub.f32 %v530_v55, %v550_v19  ;;  %v556_v7 = vunpack.c.l.bf16 %v1851_v58  ;;  %v557_v8 = vunpack.c.h.bf16 %v1851_v58 }
  0x6f   :  { %1076 = vmatmul.mubr.bf16.gmra.mrb[20].mxu1 %v119_v31  ;;  %1120 = vmatmul.mubr.bf16.gmra.mrb[20].mxu0 %v86_v13  ;;  %v561_v13 = vsub.f32 %v528_v43, %v548_v63  ;;  %v564_v31 = vsub.f32 %v531_v60, %v551_v24  ;;  %v336_v43 = vsub.f32 %v303_v17, %v323_v36 }
  0x70   :  { %1079 = vmatprep.mubr.msk.bf16.mxu1 %vm1510_vm0, %v1508_v0  ;;  %1123 = vmatprep.mubr.msk.bf16.mxu0 %vm1510_vm0, %v1508_v0  ;;  %v338_v60 = vsub.f32 %v305_v3, %v325_v51  ;;  %v569_v19 = vsub.f32 %v536_v10, %v556_v7  ;;  %v570_v24 = vsub.f32 %v537_v11, %v557_v8 }
  0x71   :  { %v574_v2 = vpack.c.bf16 %v564_v31, %v563_v30 }
  0x72   :  { %v577_v15 = vpack.c.bf16 %v570_v24, %v569_v19 }
  0x77   :  { %1080 = vmatmul.mubr.bf16.gmra.mrb[24].mxu1 %v120_v42  ;;  %1124 = vmatmul.mubr.bf16.gmra.mrb[24].mxu0 %v87_v26  ;;  %v573_v26 = vpack.c.bf16 %v562_v21, %v561_v13  ;;  %v535_v42 = vmul.f32 %v1659_v47, %v1659_v47  ;;  %v346_v47 = vpack.c.bf16 %v337_v48, %v336_v43 }
  0x78   :  { %1143 = vmatprep.mubr.msk.bf16.mxu1 %vm1510_vm0, %v1508_v0  ;;  %1231 = vmatprep.mubr.msk.bf16.mxu0 %vm1510_vm0, %v1508_v0  ;;  %v347_v13 = vpack.c.bf16 %v339_v57, %v338_v60 }
  0x79   :  { %v1825_v45 = vpack.c.bf16 %v535_v42, %v534_v41 }
  0x7b   :  { %v554_v56 = vunpack.c.l.bf16 %v1825_v45  ;;  %v555_v55 = vunpack.c.h.bf16 %v1825_v45 }
  0x7d   :  { %v567_v59 = vsub.f32 %v534_v41, %v554_v56  ;;  %v568_v62 = vsub.f32 %v535_v42, %v555_v55 }
  0x7f   :  { %1144 = vmatmul.mubr.bf16.vlgmr.msra.gmra.mrb[28].mxu1 %v343_v12  ;;  %1232 = vmatmul.mubr.bf16.vlgmr.msra.gmra.mrb[28].mxu0 %v572_v61  ;;  %v575_v12 = vpack.c.bf16 %v566_v49, %v565_v46  ;;  %v1849_v61 = vpack.c.bf16 %v308_v52, %v307_v9  ;;  %v576_v21 = vpack.c.bf16 %v568_v62, %v567_v59 }
  0x80   :  { %1172 = vmatpush3.bf16.msra.mxu1 %v1509_v1  ;;  %1260 = vmatpush3.bf16.msra.mxu0 %v1509_v1 }
  0x81   :  { %1147 = vmatprep.mubr.msk.bf16.mxu1 %vm1510_vm0, %v1508_v0  ;;  %1173 = vmatprep.subr.bf16.mxu1 %v1508_v0  ;;  %v327_v63 = vunpack.c.l.bf16 %v1849_v61  ;;  %v328_v6 = vunpack.c.h.bf16 %v1849_v61 }
  0x82   :  { %1235 = vmatprep.mubr.msk.bf16.mxu0 %vm1510_vm0, %v1508_v0  ;;  %1261 = vmatprep.subr.bf16.mxu0 %v1508_v0 }
  0x83   :  { %v340_v17 = vsub.f32 %v307_v9, %v327_v63  ;;  %v341_v18 = vsub.f32 %v308_v52, %v328_v6 }
  0x84   :  { %1174 = vmatpush3.bf16.msra.mxu1 %v1509_v1  ;;  %1262 = vmatpush3.bf16.msra.mxu0 %v1509_v1 }
  0x85   :  { %1175 = vmatprep.subr.bf16.mxu1 %v1508_v0  ;;  %1263 = vmatprep.subr.bf16.mxu0 %v1508_v0  ;;  %v348_v14 = vpack.c.bf16 %v341_v18, %v340_v17 }
  0x87   :  { %1148 = vmatmul.mubr.bf16.gmra.mrb[32].mxu1 %v344_v25  ;;  %1236 = vmatmul.mubr.bf16.gmra.mrb[32].mxu0 %v573_v26  ;;  %v316_v25 = vpack.c.bf16 %v309_v23, %v309_v23  ;;  %v545_v26 = vpack.c.bf16 %v538_v16, %v538_v16 }
  0x88   :  { %1151 = vmatprep.mubr.msk.bf16.mxu1 %vm1510_vm0, %v1508_v0  ;;  %1176 = vmatpush3.bf16.msra.mxu1 %v1509_v1 }
  0x89   :  { %1239 = vmatprep.mubr.msk.bf16.mxu0 %vm1510_vm0, %v1508_v0  ;;  %1264 = vmatpush3.bf16.msra.mxu0 %v1509_v1  ;;  %v329_v27 = vunpack.c.l.bf16 %v316_v25  ;;  %v558_v32 = vunpack.c.l.bf16 %v545_v26 }
  0x8a   :  { %1177 = vmatprep.subr.bf16.mxu1 %v1508_v0  ;;  %1265 = vmatprep.subr.bf16.mxu0 %v1508_v0 }
  0x8b   :  { %v571_v34 = vsub.f32 %v538_v16, %v558_v32 }
  0x8c   :  { %1178 = vmatpush3.bf16.msra.mxu1 %v1509_v1 }
  0x8d   :  { %1266 = vmatpush3.bf16.msra.mxu0 %v1509_v1  ;;  %1179 = vmatprep.subr.bf16.mxu1 %v1508_v0  ;;  %v578_v30 = vpack.c.bf16 %v571_v34, %v571_v34 }
  0x8e   :  { %1267 = vmatprep.subr.bf16.mxu0 %v1508_v0 }
  0x8f   :  { %1152 = vmatmul.mubr.bf16.gmra.mrb[36].mxu1 %v345_v35  ;;  %1240 = vmatmul.mubr.bf16.gmra.mrb[36].mxu0 %v574_v2 }
  0x90   :  { %1155 = vmatprep.mubr.msk.bf16.mxu1 %vm1510_vm0, %v1508_v0  ;;  %1243 = vmatprep.mubr.msk.bf16.mxu0 %vm1510_vm0, %v1508_v0 }
  0x91   :  { %1180 = vmatpush3.bf16.msra.mxu1 %v1509_v1  ;;  %1268 = vmatpush3.bf16.msra.mxu0 %v1509_v1 }
  0x92   :  { %1181 = vmatprep.subr.bf16.mxu1 %v1508_v0  ;;  %1269 = vmatprep.subr.bf16.mxu0 %v1508_v0 }
  0x95   :  { %1182 = vmatpush3.bf16.msra.mxu1 %v1509_v1  ;;  %1270 = vmatpush3.bf16.msra.mxu0 %v1509_v1 }
  0x96   :  { %1183 = vmatprep.subr.bf16.mxu1 %v1508_v0  ;;  %1271 = vmatprep.subr.bf16.mxu0 %v1508_v0 }
  0x97   :  { %1156 = vmatmul.mubr.bf16.gmra.mrb[40].mxu1 %v346_v47  ;;  %1244 = vmatmul.mubr.bf16.gmra.mrb[40].mxu0 %v575_v12 }
  0x98   :  { %1159 = vmatprep.mubr.msk.bf16.mxu1 %vm1510_vm0, %v1508_v0  ;;  %1247 = vmatprep.mubr.msk.bf16.mxu0 %vm1510_vm0, %v1508_v0 }
  0x99   :  { %1184 = vmatpush3.bf16.msra.mxu1 %v1509_v1  ;;  %1272 = vmatpush3.bf16.msra.mxu0 %v1509_v1 }
  0x9a   :  { %1185 = vmatprep.subr.bf16.mxu1 %v1508_v0  ;;  %1273 = vmatprep.subr.bf16.mxu0 %v1508_v0 }
  0x9d   :  { %1186 = vmatpush3.bf16.msra.mxu1 %v1509_v1  ;;  %1274 = vmatpush3.bf16.msra.mxu0 %v1509_v1  ;;  %v342_v1 = vsub.f32 %v309_v23, %v329_v27 }
  0x9f   :  { %1160 = vmatmul.mubr.bf16.gmra.mrb[44].mxu1 %v347_v13  ;;  %1248 = vmatmul.mubr.bf16.gmra.mrb[44].mxu0 %v576_v21  ;;  %v349_v28 = vpack.c.bf16 %v342_v1, %v342_v1 }
  0xa0   :  { %1163 = vmatprep.mubr.msk.bf16.mxu1 %vm1510_vm0, %v1508_v0  ;;  %1251 = vmatprep.mubr.msk.bf16.mxu0 %vm1510_vm0, %v1508_v0 }
  0xa7   :  { %1164 = vmatmul.mubr.bf16.gmra.mrb[48].mxu1 %v348_v14  ;;  %1252 = vmatmul.mubr.bf16.gmra.mrb[48].mxu0 %v577_v15 }
  0xa8   :  { %1167 = vmatprep.mubr.msk.bf16.mxu1 %vm1510_vm0, %v1508_v0  ;;  %1255 = vmatprep.mubr.msk.bf16.mxu0 %vm1510_vm0, %v1508_v0 }
  0xaf   :  { %1168 = vmatmul.mubr.bf16.gmra.mrb[52].mxu1 %v349_v28  ;;  %1256 = vmatmul.mubr.bf16.gmra.mrb[52].mxu0 %v578_v30 }
  0xb0   :  { %1187 = vmatprep.mubr.msk.bf16.mxu1 %vm1510_vm0, %v1508_v0  ;;  %1275 = vmatprep.mubr.msk.bf16.mxu0 %vm1510_vm0, %v1508_v0 }
  0xb7   :  { %1188 = vmatmul.mubr.bf16.vlgmr.msra.gmra.mrb[28].mxu1 %v1727_v37  ;;  %1276 = vmatmul.mubr.bf16.vlgmr.msra.gmra.mrb[28].mxu0 %v1729_v38 }
  0xb8   :  { %1191 = vmatprep.mubr.msk.bf16.mxu1 %vm1510_vm0, %v1508_v0  ;;  %1279 = vmatprep.mubr.msk.bf16.mxu0 %vm1510_vm0, %v1508_v0 }
  0xbf   :  { %1192 = vmatmul.mubr.bf16.gmra.mrb[32].mxu1 %v1747_v50  ;;  %1280 = vmatmul.mubr.bf16.gmra.mrb[32].mxu0 %v1749_v53 }
  0xc0   :  { %1195 = vmatprep.mubr.msk.bf16.mxu1 %vm1510_vm0, %v1508_v0  ;;  %1283 = vmatprep.mubr.msk.bf16.mxu0 %vm1510_vm0, %v1508_v0 }
  0xc7   :  { %1196 = vmatmul.mubr.bf16.gmra.mrb[36].mxu1 %v1767_v20  ;;  %1284 = vmatmul.mubr.bf16.gmra.mrb[36].mxu0 %v1769_v22 }
  0xc8   :  { %1199 = vmatprep.mubr.msk.bf16.mxu1 %vm1510_vm0, %v1508_v0  ;;  %1287 = vmatprep.mubr.msk.bf16.mxu0 %vm1510_vm0, %v1508_v0 }
  0xcf   :  { %1200 = vmatmul.mubr.bf16.gmra.mrb[40].mxu1 %v1795_v29  ;;  %1288 = vmatmul.mubr.bf16.gmra.mrb[40].mxu0 %v1797_v33 }
  0xd0   :  { %1203 = vmatprep.mubr.msk.bf16.mxu1 %vm1510_vm0, %v1508_v0  ;;  %1291 = vmatprep.mubr.msk.bf16.mxu0 %vm1510_vm0, %v1508_v0 }
  0xd7   :  { %1204 = vmatmul.mubr.bf16.gmra.mrb[44].mxu1 %v1823_v44  ;;  %1292 = vmatmul.mubr.bf16.gmra.mrb[44].mxu0 %v1825_v45 }
  0xd8   :  { %1207 = vmatprep.mubr.msk.bf16.mxu1 %vm1510_vm0, %v1508_v0  ;;  %1295 = vmatprep.mubr.msk.bf16.mxu0 %vm1510_vm0, %v1508_v0 }
  0xdf   :  { %1208 = vmatmul.mubr.bf16.gmra.mrb[48].mxu1 %v1849_v61  ;;  %1296 = vmatmul.mubr.bf16.gmra.mrb[48].mxu0 %v1851_v58 }
  0xe0   :  { %1211 = vmatprep.mubr.msk.bf16.mxu1 %vm1510_vm0, %v1508_v0  ;;  %1299 = vmatprep.mubr.msk.bf16.mxu0 %vm1510_vm0, %v1508_v0 }
  0xe7   :  { %1212 = vmatmul.mubr.bf16.gmra.mrb[52].mxu1 %v316_v25  ;;  %1300 = vmatmul.mubr.bf16.gmra.mrb[52].mxu0 %v545_v26 }
 0x11a   :  { %v155_v37 = vpop.f32.mrb[0].mxu1  ;;  %v243_v38 = vpop.f32.mrb[0].mxu0 }
 0x11b   :  { %v1921_v50 = vadd.f32 %v243_v38, %v155_v37  ;;  %v1057_v53 = vpop.f32.mrb[1].mxu1  ;;  %v1101_v20 = vpop.f32.mrb[1].mxu0 }
 0x11c   :  { %v158_v22 = vpop.f32.mrb[2].mxu1  ;;  %v246_v29 = vpop.f32.mrb[2].mxu0 }
 0x11d   :  { %v1923_v31 = vadd.f32 %v246_v29, %v158_v22  ;;  %v1058_v33 = vpop.f32.mrb[3].mxu1  ;;  %v1102_v35 = vpop.f32.mrb[3].mxu0 }
 0x122   :  { %v163_v36 = vpop.f32.mrb[4].mxu1  ;;  %v251_v39 = vpop.f32.mrb[4].mxu0 }
 0x123   :  { %v1925_v2 = vadd.f32 %v251_v39, %v163_v36  ;;  %v1061_v3 = vpop.f32.mrb[5].mxu1  ;;  %v1105_v0 = vpop.f32.mrb[5].mxu0 }
 0x124   :  { %v166_v4 = vpop.f32.mrb[6].mxu1  ;;  %v254_v5 = vpop.f32.mrb[6].mxu0 }
 0x125   :  { %v1927_v40 = vadd.f32 %v254_v5, %v166_v4  ;;  %v1062_v41 = vpop.f32.mrb[7].mxu1  ;;  %v1106_v42 = vpop.f32.mrb[7].mxu0 }
 0x12a   :  { %v171_v43 = vpop.f32.mrb[8].mxu1  ;;  %v259_v48 = vpop.f32.mrb[8].mxu0 }
 0x12b   :  { %v1929_v44 = vadd.f32 %v259_v48, %v171_v43  ;;  %v1065_v46 = vpop.f32.mrb[9].mxu1  ;;  %v1109_v49 = vpop.f32.mrb[9].mxu0 }
 0x12c   :  { %v174_v45 = vpop.f32.mrb[10].mxu1  ;;  %v262_v47 = vpop.f32.mrb[10].mxu0 }
 0x12d   :  { %v1931_v9 = vadd.f32 %v262_v47, %v174_v45  ;;  %v1066_v51 = vpop.f32.mrb[11].mxu1  ;;  %v1110_v52 = vpop.f32.mrb[11].mxu0 }
 0x132   :  { %v179_v10 = vpop.f32.mrb[12].mxu1  ;;  %v267_v11 = vpop.f32.mrb[12].mxu0 }
 0x133   :  { %v1933_v12 = vadd.f32 %v267_v11, %v179_v10  ;;  %v1069_v54 = vpop.f32.mrb[13].mxu1  ;;  %v1113_v56 = vpop.f32.mrb[13].mxu0 }
 0x134   :  { %v182_v55 = vpop.f32.mrb[14].mxu1  ;;  %v270_v60 = vpop.f32.mrb[14].mxu0 }
 0x135   :  { %v1935_v61 = vadd.f32 %v270_v60, %v182_v55  ;;  %v1070_v58 = vpop.f32.mrb[15].mxu1  ;;  %v1114_v57 = vpop.f32.mrb[15].mxu0 }
 0x13a   :  { %v187_v59 = vpop.f32.mrb[16].mxu1  ;;  %v275_v62 = vpop.f32.mrb[16].mxu0 }
 0x13b   :  { %v1937_v63 = vadd.f32 %v275_v62, %v187_v59  ;;  %v1073_v6 = vpop.f32.mrb[17].mxu1  ;;  %v1117_v7 = vpop.f32.mrb[17].mxu0 }
 0x13c   :  { %v190_v8 = vpop.f32.mrb[18].mxu1  ;;  %v278_v13 = vpop.f32.mrb[18].mxu0 }
 0x13d   :  { %v1939_v21 = vadd.f32 %v278_v13, %v190_v8  ;;  %v1074_v23 = vpop.f32.mrb[19].mxu1  ;;  %v1118_v16 = vpop.f32.mrb[19].mxu0 }
 0x142   :  { %v195_v17 = vpop.f32.mrb[20].mxu1  ;;  %v283_v18 = vpop.f32.mrb[20].mxu0 }
 0x143   :  { %v1941_v19 = vadd.f32 %v283_v18, %v195_v17  ;;  %v1077_v24 = vpop.f32.mrb[21].mxu1  ;;  %v1121_v25 = vpop.f32.mrb[21].mxu0 }
 0x144   :  { %v198_v26 = vpop.f32.mrb[22].mxu1  ;;  %v286_v14 = vpop.f32.mrb[22].mxu0 }
 0x145   :  { %v1943_v15 = vadd.f32 %v286_v14, %v198_v26  ;;  %v1078_v27 = vpop.f32.mrb[23].mxu1  ;;  %v1122_v32 = vpop.f32.mrb[23].mxu0 }
 0x14a   :  { %v203_v1 = vpop.f32.mrb[24].mxu1  ;;  %v291_v34 = vpop.f32.mrb[24].mxu0 }
 0x14b   :  { %v1945_v28 = vadd.f32 %v291_v34, %v203_v1  ;;  %v1081_v30 = vpop.f32.mrb[25].mxu1  ;;  %v1125_v37 = vpop.f32.mrb[25].mxu0 }
 0x14c   :  { %v206_v38 = vpop.f32.mrb[26].mxu1  ;;  %v294_v53 = vpop.f32.mrb[26].mxu0 }
 0x14d   :  { %v1082_v20 = vpop.f32.mrb[27].mxu1  ;;  %v1126_v22 = vpop.f32.mrb[27].mxu0 }
 0x18a   :  { %v472_v29 = vpop.f32.mrb[28].mxu1  ;;  %v701_v33 = vpop.f32.mrb[28].mxu0 }
 0x18b   :  { %v755_v35 = vmax.f32 %v472_v29, 1e-16  ;;  %v794_v36 = vmax.f32 %v701_v33, 1e-16  ;;  %v1189_v39 = vpop.f32.mrb[29].mxu1  ;;  %v1277_v3 = vpop.f32.mrb[29].mxu0 }
 0x18c   :  { %v475_v0 = vpop.f32.mrb[30].mxu1  ;;  %v704_v4 = vpop.f32.mrb[30].mxu0 }
 0x18d   :  { %1380 = vrsqrt.f32 %v755_v35  ;;  %v756_v5 = vmax.f32 %v475_v0, 1e-16  ;;  %v795_v41 = vmax.f32 %v704_v4, 1e-16  ;;  %v1190_v42 = vpop.f32.mrb[31].mxu1  ;;  %v1278_v43 = vpop.f32.mrb[31].mxu0 }
 0x18e   :  { %1382 = vrsqrt.f32 %v794_v36 }
 0x18f   :  { %1384 = vrsqrt.f32 %v756_v5 }
 0x190   :  { %1386 = vrsqrt.f32 %v795_v41 }
 0x192   :  { %v480_v48 = vpop.f32.mrb[32].mxu1  ;;  %v709_v46 = vpop.f32.mrb[32].mxu0 }
 0x193   :  { %v757_v49 = vmax.f32 %v480_v48, 1e-16  ;;  %v796_v45 = vmax.f32 %v709_v46, 1e-16  ;;  %v1193_v47 = vpop.f32.mrb[33].mxu1  ;;  %v1281_v51 = vpop.f32.mrb[33].mxu0 }
 0x194   :  { %v483_v52 = vpop.f32.mrb[34].mxu1  ;;  %v712_v10 = vpop.f32.mrb[34].mxu0 }
 0x195   :  { %1388 = vrsqrt.f32 %v757_v49  ;;  %v758_v11 = vmax.f32 %v483_v52, 1e-16  ;;  %v797_v54 = vmax.f32 %v712_v10, 1e-16  ;;  %v1194_v56 = vpop.f32.mrb[35].mxu1  ;;  %v1282_v55 = vpop.f32.mrb[35].mxu0 }
 0x196   :  { %1390 = vrsqrt.f32 %v796_v45 }
 0x197   :  { %v1381_v60 = vpop.eup %1380  ;;  %1392 = vrsqrt.f32 %v758_v11 }
 0x198   :  { %v1383_v58 = vpop.eup %1382  ;;  %v781_v57 = vmul.f32 %v1381_v60, %v1921_v50  ;;  %1394 = vrsqrt.f32 %v797_v54 }
 0x199   :  { %v1385_v59 = vpop.eup %1384 }
 0x19a   :  { %v820_v62 = vmul.f32 %v1383_v58, %v781_v57  ;;  %v782_v6 = vmul.f32 %v1385_v59, %v1923_v31  ;;  %v488_v7 = vpop.f32.mrb[36].mxu1  ;;  %v717_v8 = vpop.f32.mrb[36].mxu0 }
 0x19b   :  { %v1387_v13 = vpop.eup %1386  ;;  %v759_v23 = vmax.f32 %v488_v7, 1e-16  ;;  %v798_v16 = vmax.f32 %v717_v8, 1e-16  ;;  %v1197_v17 = vpop.f32.mrb[37].mxu1 }
 0x19c   :  { %v1285_v18 = vpop.f32.mrb[37].mxu0  ;;  %v821_v24 = vmul.f32 %v1387_v13, %v782_v6  ;;  %v491_v25 = vpop.f32.mrb[38].mxu1 }
 0x19d   :  { %v720_v26 = vpop.f32.mrb[38].mxu0  ;;  %1396 = vrsqrt.f32 %v759_v23  ;;  %v760_v14 = vmax.f32 %v491_v25, 1e-16  ;;  %v1198_v32 = vpop.f32.mrb[39].mxu1 }
 0x19e   :  { %v799_v27 = vmax.f32 %v720_v26, 1e-16  ;;  %v1286_v50 = vpop.f32.mrb[39].mxu0  ;;  %v914_v1 = vadd.f32 %v821_v24, %v820_v62  ;;  %1398 = vrsqrt.f32 %v798_v16 }
 0x19f   :  { %v1389_v34 = vpop.eup %1388  ;;  %1400 = vrsqrt.f32 %v760_v14 }
 0x1a0   :  { %v1391_v31 = vpop.eup %1390  ;;  %v783_v30 = vmul.f32 %v1389_v34, %v1925_v2  ;;  %1402 = vrsqrt.f32 %v799_v27 }
 0x1a1   :  { %v1393_v37 = vpop.eup %1392 }
 0x1a2   :  { %v822_v38 = vmul.f32 %v1391_v31, %v783_v30  ;;  %v784_v53 = vmul.f32 %v1393_v37, %v1927_v40  ;;  %v496_v20 = vpop.f32.mrb[40].mxu1  ;;  %v725_v22 = vpop.f32.mrb[40].mxu0 }
 0x1a3   :  { %v1395_v29 = vpop.eup %1394  ;;  %v761_v33 = vmax.f32 %v496_v20, 1e-16  ;;  %v800_v35 = vmax.f32 %v725_v22, 1e-16  ;;  %v1201_v36 = vpop.f32.mrb[41].mxu1 }
 0x1a4   :  { %v1289_v39 = vpop.f32.mrb[41].mxu0  ;;  %v915_v3 = vadd.f32 %v914_v1, %v822_v38  ;;  %v823_v0 = vmul.f32 %v1395_v29, %v784_v53  ;;  %v499_v4 = vpop.f32.mrb[42].mxu1 }
 0x1a5   :  { %v728_v5 = vpop.f32.mrb[42].mxu0  ;;  %1404 = vrsqrt.f32 %v761_v33  ;;  %v762_v41 = vmax.f32 %v499_v4, 1e-16  ;;  %v1202_v2 = vpop.f32.mrb[43].mxu1 }
 0x1a6   :  { %v801_v42 = vmax.f32 %v728_v5, 1e-16  ;;  %v1290_v43 = vpop.f32.mrb[43].mxu0  ;;  %v916_v48 = vadd.f32 %v915_v3, %v823_v0  ;;  %1406 = vrsqrt.f32 %v800_v35 }
 0x1a7   :  { %v1397_v46 = vpop.eup %1396  ;;  %1408 = vrsqrt.f32 %v762_v41 }
 0x1a8   :  { %v1399_v40 = vpop.eup %1398  ;;  %v785_v49 = vmul.f32 %v1397_v46, %v1929_v44  ;;  %1410 = vrsqrt.f32 %v801_v42 }
 0x1a9   :  { %v1401_v45 = vpop.eup %1400 }
 0x1aa   :  { %v824_v47 = vmul.f32 %v1399_v40, %v785_v49  ;;  %v786_v51 = vmul.f32 %v1401_v45, %v1931_v9  ;;  %v504_v52 = vpop.f32.mrb[44].mxu1  ;;  %v733_v10 = vpop.f32.mrb[44].mxu0 }
 0x1ab   :  { %v1403_v11 = vpop.eup %1402  ;;  %v763_v54 = vmax.f32 %v504_v52, 1e-16  ;;  %v802_v56 = vmax.f32 %v733_v10, 1e-16  ;;  %v1205_v55 = vpop.f32.mrb[45].mxu1 }
 0x1ac   :  { %v1293_v60 = vpop.f32.mrb[45].mxu0  ;;  %v917_v58 = vadd.f32 %v916_v48, %v824_v47  ;;  %v825_v57 = vmul.f32 %v1403_v11, %v786_v51  ;;  %v507_v59 = vpop.f32.mrb[46].mxu1 }
 0x1ad   :  { %v736_v62 = vpop.f32.mrb[46].mxu0  ;;  %1412 = vrsqrt.f32 %v763_v54  ;;  %v764_v6 = vmax.f32 %v507_v59, 1e-16  ;;  %v1206_v44 = vpop.f32.mrb[47].mxu1 }
 0x1ae   :  { %v803_v7 = vmax.f32 %v736_v62, 1e-16  ;;  %v1294_v8 = vpop.f32.mrb[47].mxu0  ;;  %v918_v13 = vadd.f32 %v917_v58, %v825_v57  ;;  %1414 = vrsqrt.f32 %v802_v56 }
 0x1af   :  { %v1405_v23 = vpop.eup %1404  ;;  %1416 = vrsqrt.f32 %v764_v6 }
 0x1b0   :  { %v1407_v9 = vpop.eup %1406  ;;  %v787_v16 = vmul.f32 %v1405_v23, %v1933_v12  ;;  %1418 = vrsqrt.f32 %v803_v7 }
 0x1b1   :  { %v1409_v17 = vpop.eup %1408 }
 0x1b2   :  { %v826_v18 = vmul.f32 %v1407_v9, %v787_v16  ;;  %v788_v24 = vmul.f32 %v1409_v17, %v1935_v61  ;;  %v512_v25 = vpop.f32.mrb[48].mxu1  ;;  %v741_v26 = vpop.f32.mrb[48].mxu0 }
 0x1b3   :  { %v1411_v14 = vpop.eup %1410  ;;  %v765_v27 = vmax.f32 %v512_v25, 1e-16  ;;  %v804_v32 = vmax.f32 %v741_v26, 1e-16  ;;  %v1209_v50 = vpop.f32.mrb[49].mxu1 }
 0x1b4   :  { %v1297_v1 = vpop.f32.mrb[49].mxu0  ;;  %v919_v34 = vadd.f32 %v918_v13, %v826_v18  ;;  %v827_v31 = vmul.f32 %v1411_v14, %v788_v24  ;;  %v515_v30 = vpop.f32.mrb[50].mxu1 }
 0x1b5   :  { %v744_v37 = vpop.f32.mrb[50].mxu0  ;;  %1420 = vrsqrt.f32 %v765_v27  ;;  %v766_v38 = vmax.f32 %v515_v30, 1e-16  ;;  %v1210_v12 = vpop.f32.mrb[51].mxu1 }
 0x1b6   :  { %v805_v53 = vmax.f32 %v744_v37, 1e-16  ;;  %v1298_v20 = vpop.f32.mrb[51].mxu0  ;;  %v920_v22 = vadd.f32 %v919_v34, %v827_v31  ;;  %1422 = vrsqrt.f32 %v804_v32 }
 0x1b7   :  { %v1413_v29 = vpop.eup %1412  ;;  %1424 = vrsqrt.f32 %v766_v38 }
 0x1b8   :  { %v1415_v61 = vpop.eup %1414  ;;  %v789_v33 = vmul.f32 %v1413_v29, %v1937_v63  ;;  %1426 = vrsqrt.f32 %v805_v53  ;;  %v834_v63 = vlaneseq }
 0x1b9   :  { %v1417_v35 = vpop.eup %1416 }
 0x1ba   :  { %v828_v36 = vmul.f32 %v1415_v61, %v789_v33  ;;  %v790_v39 = vmul.f32 %v1417_v35, %v1939_v21  ;;  %v520_v3 = vpop.f32.mrb[52].mxu1  ;;  %v749_v0 = vpop.f32.mrb[52].mxu0  ;;  %v835_v11 = vshrl.u32 %v834_v63, 7 }
 0x1bb   :  { %v1419_v4 = vpop.eup %1418  ;;  %v767_v5 = vmax.f32 %v520_v3, 1e-16  ;;  %v806_v41 = vmax.f32 %v749_v0, 1e-16  ;;  %v1213_v42 = vpop.f32.mrb[53].mxu1 }
 0x1bc   :  { %v1301_v2 = vpop.f32.mrb[53].mxu0  ;;  %v921_v43 = vadd.f32 %v920_v22, %v828_v36  ;;  %v829_v48 = vmul.f32 %v1419_v4, %v790_v39  ;;  %v523_v46 = vpop.f32.mrb[54].mxu1  ;;  %v847_v57 = vadd.s32 96, %v835_v11 }
 0x1bd   :  { %v752_v40 = vpop.f32.mrb[54].mxu0  ;;  %1428 = vrsqrt.f32 %v767_v5  ;;  %v1214_v49 = vpop.f32.mrb[55].mxu1 }
 0x1be   :  { %v1302_v45 = vpop.f32.mrb[55].mxu0  ;;  %v922_v47 = vadd.f32 %v921_v43, %v829_v48  ;;  %1430 = vrsqrt.f32 %v806_v41  ;;  %vm874_vm1 = vcmp.lt.s32.totalorder %v847_v57, 100 }
 0x1bf   :  { %v1421_v51 = vpop.eup %1420 }
 0x1c0   :  { %v1423_v52 = vpop.eup %1422  ;;  %v791_v21 = vmul.f32 %v1421_v51, %v1941_v19 }
 0x1c1   :  { %v1425_v10 = vpop.eup %1424 }
 0x1c2   :  { %v830_v54 = vmul.f32 %v1423_v52, %v791_v21  ;;  %v792_v56 = vmul.f32 %v1425_v10, %v1943_v15  ;;  %v1427_v55 = vpop.eup %1426 }
 0x1c4   :  { %v831_v60 = vmul.f32 %v1427_v55, %v792_v56  ;;  %v923_v58 = vadd.f32 %v922_v47, %v830_v54 }
 0x1c6   :  { %v924_v59 = vadd.f32 %v923_v58, %v831_v60 }
 0x1c7   :  { %v1429_v62 = vpop.eup %1428 }
 0x1c8   :  { %v793_v6 = vmul.f32 %v1429_v62, %v1945_v28  ;;  %v1431_v7 = vpop.eup %1430 }
 0x1ca   :  { %v832_v44 = vmul.f32 %v1431_v7, %v793_v6 }
 0x1cc   :  { %v913_v8 = vsel %vm874_vm1, %v832_v44, 0.0 }
 0x1cd   :  { %v925_v13 = vadd.f32 %v924_v59, %v913_v8 }
 0x1cf   :  { %v926_v23 = vrot.slane %v925_v13, 4 }
 0x1d1   :  { %v927_v19 = vadd.f32 %v926_v23, %v925_v13 }
 0x1d3   :  { %v928_v9 = vrot.slane %v927_v19, 2 }
 0x1d5   :  { %v929_v16 = vadd.f32 %v928_v9, %v927_v19 }
 0x1d7   :  { %v930_v15 = vrot.slane %v929_v16, 1 }
 0x1d9   :  { %v931_v17 = vadd.f32 %v930_v15, %v929_v16 }
 0x1db   :  { %932 = vst [vmem:[#allocation7] sm:$0xff] %v931_v17 }
 0x1dc   :  { %1487 = shalt.err (!%p1484_p6)
}
 0x1dd   :  { %s1488_s10 = scalar_lea.hbm %s1974_s2, 128 }
 0x1de   :  { %p1489_p7 = scmp.ne.s32.totalorder %s1974_s2, %s1488_s10  ;;  %p1492_p8 = scmp.lt.u32.totalorder %s1488_s10, %s1974_s2 }
 0x1e0   :  { %p1494_p9 = pnand %p1492_p8, %p1489_p7 }
 0x1e2   :  { %1497 = shalt.err (!%p1494_p9)
}
 0x1e3   :  { %942 = dma.vmem_to_hbm [thread:$0]  %s940_s6, 128, %s1974_s2, [#allocation4]  }
 0x1e4   :  { %1502 = dma.done.wait [#allocation4], 128  }
 0x1e5   :  { %1503 = vsyncadd [#allocation4], 4294967168 }
 0x1e6   :  { %946 = vsyncpa [#allocation3], 1 }
 0x1e7   :  { %947 = vsyncpa [#allocation6], 1 }
 0x1e8   :  { %948 = vsyncpa [#allocation4], 1 }

</bundles_post_ra>
